<compile_context>
chip_gen: v7x
topology: tpu7x:2x2x1
jax: 0.10.0
libtpu: 0.0.40
codegen_flags: <defaults>
</compile_context>

<pallas_src>
import jax
import jax.numpy as jnp
from jax.experimental import pallas as pl
from jax.experimental.pallas import tpu as pltpu

NEG_POS_RATIO = 3
NUM_CLASSES = 4          # class-weight vector cew = [1, 2, 2, ...] (deterministic init)
LANES = 128
MAX_BLOCK_ROWS = 256     # 256 rows x 128 lanes = 32768 anchors per grid step


def _round_up(x, m):
    return ((x + m - 1) // m) * m


def _layout(a_total):
    rows = _round_up(a_total, LANES) // LANES
    block_rows = min(MAX_BLOCK_ROWS, _round_up(rows, 8))
    rows_pad = _round_up(rows, block_rows)
    return rows_pad, block_rows


# ----------------------------- Kernel 1 -------------------------------------
def _per_anchor_kernel(conf_pred_ref, labels_ref, valid_ref, loc_pred_ref, loc_ref,
                       ce_ref, mdiff_ref, base_ref, pos_part_ref, sl1_part_ref):
    # conf_pred_ref: (C, R, 128)   loc_pred_ref/loc_ref: (4, R, 128)
    # labels_ref:    (R, 128) int32    valid_ref: (R, 128) f32 (1=real anchor)
    labels = labels_ref[...]
    valid = valid_ref[...]
    C = conf_pred_ref.shape[0]
    R = labels.shape[0]

    # Unrolled over the C class slabs: full-lane VPU/EUP work, no XLU reduces.
    lcs = [conf_pred_ref[c].astype(jnp.float32) for c in range(C)]
    bg = lcs[0]

    m = bg
    for c in range(1, C):
        m = jnp.maximum(m, lcs[c])
    nonbg = lcs[1]
    for c in range(2, C):
        nonbg = jnp.maximum(nonbg, lcs[c])

    s = jnp.zeros_like(bg)
    tgt = jnp.zeros_like(bg)
    for c in range(C):
        s = s + jnp.exp(lcs[c] - m)
        tgt = tgt + jnp.where(labels == c, lcs[c], 0.0)
    lse = m + jnp.log(s)

    # weighted cross-entropy:  cew[y] * (logsumexp(x) - x[y]),  cew = [1,2,2,...]
    w = jnp.where(labels == 0, 1.0, 2.0)
    ce_ref[...] = w * (lse - tgt)

    # background near-miss diffs + masks
    pred_bg = bg >= nonbg                                   # argmax(conf_pred) == 0
    posf = (labels > 0).astype(jnp.float32) * valid
    pposf = jnp.logical_not(pred_bg).astype(jnp.float32) * valid
    elig = (labels == 0) & pred_bg & (valid > 0.5)          # true-neg & pred-bg & real
    diffs = jnp.abs(bg - nonbg)
    mdiff_ref[...] = jnp.where(elig, diffs, jnp.inf)
    base_ref[...] = jnp.maximum(posf, pposf)                # pos | pred_pos

    # smooth-L1 (beta=1) over the 4 coord slabs, masked by pos
    sl1 = jnp.zeros_like(bg)
    for c in range(4):
        d = loc_pred_ref[c].astype(jnp.float32) - loc_ref[c].astype(jnp.float32)
        ad = jnp.abs(d)
        sl1 = sl1 + jnp.where(ad < 1.0, 0.5 * d * d, ad - 0.5)
    sl1 = sl1 * posf

    # Threshold-independent reductions, fused here as per-tile (8,128) partials
    # (pure vreg adds: reshape only splits the sublane axis).
    pos_part_ref[...] = jnp.sum(posf.reshape(R // 8, 8, LANES), axis=0)
    sl1_part_ref[...] = jnp.sum(sl1.reshape(R // 8, 8, LANES), axis=0)


def per_anchor_stats(conf_pred_t, labels_r, valid_r, loc_pred_t, loc_t,
                     rows_pad, block_rows):
    C = conf_pred_t.shape[0]
    num_tiles = rows_pad // block_rows
    dense = jax.ShapeDtypeStruct((rows_pad, LANES), jnp.float32)
    part = jax.ShapeDtypeStruct((num_tiles * 8, LANES), jnp.float32)
    return pl.pallas_call(
        _per_anchor_kernel,
        out_shape=(dense, dense, dense, part, part),
        grid_spec=pltpu.PrefetchScalarGridSpec(
            num_scalar_prefetch=0,
            grid=(num_tiles,),
            in_specs=[
                pl.BlockSpec((C, block_rows, LANES), lambda i: (0, i, 0)),
                pl.BlockSpec((block_rows, LANES), lambda i: (i, 0)),
                pl.BlockSpec((block_rows, LANES), lambda i: (i, 0)),
                pl.BlockSpec((4, block_rows, LANES), lambda i: (0, i, 0)),
                pl.BlockSpec((4, block_rows, LANES), lambda i: (0, i, 0)),
            ],
            out_specs=[
                pl.BlockSpec((block_rows, LANES), lambda i: (i, 0)),
                pl.BlockSpec((block_rows, LANES), lambda i: (i, 0)),
                pl.BlockSpec((block_rows, LANES), lambda i: (i, 0)),
                pl.BlockSpec((8, LANES), lambda i: (i, 0)),
                pl.BlockSpec((8, LANES), lambda i: (i, 0)),
            ],
        ),
        compiler_params=pltpu.CompilerParams(
            dimension_semantics=("parallel",)),
    )(conf_pred_t, labels_r, valid_r, loc_pred_t, loc_t)


# ----------------------------- Kernel 2 -------------------------------------
def _reduce_kernel(thr_ref, ce_ref, mdiff_ref, base_ref,
                   conf_part_ref, cnt_part_ref):
    thr = thr_ref[0]
    R = base_ref.shape[0]
    nm = (mdiff_ref[...] < thr).astype(jnp.float32)   # already eligibility-masked
    all_mask = jnp.maximum(base_ref[...], nm)
    wce = ce_ref[...] * all_mask
    # per-tile (8,128) partials; cross-lane reduce happens once in JAX outside
    conf_part_ref[...] = jnp.sum(wce.reshape(R // 8, 8, LANES), axis=0)
    cnt_part_ref[...] = jnp.sum(all_mask.reshape(R // 8, 8, LANES), axis=0)


def masked_reductions(thr, ce, mdiff, base, rows_pad, block_rows):
    num_tiles = rows_pad // block_rows
    part = jax.ShapeDtypeStruct((num_tiles * 8, LANES), jnp.float32)
    return pl.pallas_call(
        _reduce_kernel,
        out_shape=(part, part),
        grid_spec=pltpu.PrefetchScalarGridSpec(
            num_scalar_prefetch=1,
            grid=(num_tiles,),
            in_specs=[pl.BlockSpec((block_rows, LANES), lambda i, thr: (i, 0))] * 3,
            out_specs=[pl.BlockSpec((8, LANES), lambda i, thr: (i, 0))] * 2,
        ),
        compiler_params=pltpu.CompilerParams(
            dimension_semantics=("parallel",)),
    )(thr, ce, mdiff, base)


# ----------------------------- Wrapper --------------------------------------
def near_miss_loss(conf_pred, loc_pred, conf, loc, neg_pos_ratio=NEG_POS_RATIO):
    B, N, C = conf_pred.shape
    A = B * N
    rows_pad, block_rows = _layout(A)
    A_pad = rows_pad * LANES
    pad = A_pad - A

    cp = jnp.pad(conf_pred.reshape(A, C).astype(jnp.float32), ((0, pad), (0, 0)))
    lp = jnp.pad(loc_pred.reshape(A, 4).astype(jnp.float32), ((0, pad), (0, 0)))
    lt = jnp.pad(loc.reshape(A, 4).astype(jnp.float32), ((0, pad), (0, 0)))
    cf = jnp.pad(conf.reshape(A).astype(jnp.int32), ((0, pad),))

    # Lane-dense layout: anchors on the lane axis, class/coord as leading slabs.
    cp_t = cp.T.reshape(C, rows_pad, LANES)
    lp_t = lp.T.reshape(4, rows_pad, LANES)
    lt_t = lt.T.reshape(4, rows_pad, LANES)
    cf_r = cf.reshape(rows_pad, LANES)
    valid = (jnp.arange(A_pad, dtype=jnp.int32) < A).astype(jnp.float32)
    valid = valid.reshape(rows_pad, LANES)

    ce, mdiff, base, pos_part, sl1_part = per_anchor_stats(
        cp_t, cf_r, valid, lp_t, lt_t, rows_pad, block_rows)

    num_pos = jnp.sum(pos_part)          # threshold-independent, fused in kernel 1
    loc_sum = jnp.sum(sl1_part)

    # TODO(synk): the data-dependent-k "k-th smallest" selection (PyTorch
    # topk(cnt, largest=False).max()) has no clean Pallas TPU equivalent; it
    # is done with an XLA sort here.  A bucketed/histogram k-th-smallest pass
    # would make it O(A) for production SSD anchor counts.
    cnt = num_pos.astype(jnp.int32) * neg_pos_ratio
    sorted_d = jnp.sort(mdiff.reshape(-1))          # ineligible/padded entries are +inf
    thr = jax.lax.dynamic_index_in_dim(sorted_d, jnp.maximum(cnt - 1, 0),
                                       keepdims=False)

    conf_part, cnt_part = masked_reductions(
        jnp.reshape(thr, (1,)).astype(jnp.float32), ce, mdiff, base,
        rows_pad, block_rows)
    nmb = jnp.sum(cnt_part)              # NOTE: nmb==0 (no matches) gives NaN, same as ref
    conf_loss = jnp.sum(conf_part) / nmb
    loc_loss = loc_sum / nmb
    return loc_loss, conf_loss


# ----------------------------- Reference (pure JAX) --------------------------
def near_miss_loss_ref(conf_pred, loc_pred, conf, loc,
                       neg_pos_ratio=NEG_POS_RATIO, num_classes=NUM_CLASSES):
    pos_mask = conf > 0
    pred_cls = jnp.argmax(conf_pred, axis=2)
    pred_pos_mask = pred_cls > 0
    cnt = jnp.sum(pos_mask).astype(jnp.int32) * neg_pos_ratio
    true_neg = conf == 0
    pred_bg = pred_cls == 0
    bg = conf_pred[:, :, 0]
    nonbg = jnp.max(conf_pred[:, :, 1:], axis=2)
    diffs = jnp.abs(bg - nonbg)
    md = jnp.where(true_neg & pred_bg, diffs, jnp.inf)
    thr = jax.lax.dynamic_index_in_dim(jnp.sort(md.reshape(-1)), cnt - 1,
                                       keepdims=False)
    nm = (diffs < thr) & true_neg & pred_bg
    all_mask = pos_mask | pred_pos_mask | nm

    cew = jnp.ones((num_classes,), jnp.float32).at[1:].set(2.0)
    logits = conf_pred.reshape(-1, num_classes)
    labels = conf.reshape(-1)
    lse = jax.scipy.special.logsumexp(logits, axis=-1)
    tgt = jnp.take_along_axis(logits, labels[:, None], axis=1)[:, 0]
    ce = cew[labels] * (lse - tgt)
    nmb = jnp.sum(all_mask).astype(jnp.float32)
    conf_loss = jnp.sum(ce * all_mask.reshape(-1)) / nmb

    d = loc_pred - loc
    ad = jnp.abs(d)
    sl1 = jnp.where(ad < 1.0, 0.5 * d * d, ad - 0.5)
    loc_loss = jnp.sum(sl1 * pos_mask[..., None]) / nmb
    return loc_loss, conf_loss


if __name__ == "__main__":
    key = jax.random.PRNGKey(0)
    k1, k2, k3, k4, k5 = jax.random.split(key, 5)

    B, N, C = 2, 128, NUM_CLASSES
    conf_pred = jax.random.normal(k1, (B, N, C), jnp.float32)
    conf_pred = conf_pred.at[:, :, 0].add(2.0)   # bias predictions toward bg
    loc_pred = jax.random.normal(k2, (B, N, 4), jnp.float32)
    loc = jax.random.normal(k3, (B, N, 4), jnp.float32)

    is_pos = jax.random.uniform(k4, (B, N)) < 0.06
    rand_cls = jax.random.randint(k5, (B, N), 1, C)
    conf = jnp.where(is_pos, rand_cls, 0).astype(jnp.int32)
    # guarantee a handful of positives so cnt = ratio * num_pos > 0
    conf = conf.at[0, 0:3].set(jnp.array([1, 2, 3], jnp.int32))
    conf = conf.at[1, 0:3].set(jnp.array([3, 1, 2], jnp.int32))

    loc_loss, conf_loss = near_miss_loss(conf_pred, loc_pred, conf, loc)
    jax.block_until_ready((loc_loss, conf_loss))

    loc_ref, conf_ref = near_miss_loss_ref(conf_pred, loc_pred, conf, loc)
    assert jnp.allclose(loc_loss, loc_ref, rtol=1e-3, atol=1e-4), (loc_loss, loc_ref)
    assert jnp.allclose(conf_loss, conf_ref, rtol=1e-3, atol=1e-4), (conf_loss, conf_ref)

    print("KERNEL_OK")
</pallas_src>

<mosaic_0001>
module attributes {stable_mosaic.version = 11 : i64} {
  func.func @_per_anchor_kernel(%arg0: i32, %arg1: memref<4x8x128xf32, #tpu.memory_space<vmem>>, %arg2: memref<8x128xi32, #tpu.memory_space<vmem>>, %arg3: memref<8x128xf32, #tpu.memory_space<vmem>>, %arg4: memref<4x8x128xf32, #tpu.memory_space<vmem>>, %arg5: memref<4x8x128xf32, #tpu.memory_space<vmem>>, %arg6: memref<8x128xf32, #tpu.memory_space<vmem>>, %arg7: memref<8x128xf32, #tpu.memory_space<vmem>>, %arg8: memref<8x128xf32, #tpu.memory_space<vmem>>, %arg9: memref<8x128xf32, #tpu.memory_space<vmem>>, %arg10: memref<8x128xf32, #tpu.memory_space<vmem>>) attributes {dimension_semantics = [#tpu.dimension_semantics<parallel>], iteration_bounds = array<i64: 1>, scalar_prefetch = 0 : i64, scratch_operands = 0 : i64, tpu.core_type = #tpu.core_type<tc>, window_params = [{transform_indices = @transform_0, window_bounds = array<i64: 4, 8, 128>}, {transform_indices = @transform_1, window_bounds = array<i64: 8, 128>}, {transform_indices = @transform_2, window_bounds = array<i64: 8, 128>}, {transform_indices = @transform_3, window_bounds = array<i64: 4, 8, 128>}, {transform_indices = @transform_4, window_bounds = array<i64: 4, 8, 128>}, {transform_indices = @transform_5, window_bounds = array<i64: 8, 128>}, {transform_indices = @transform_6, window_bounds = array<i64: 8, 128>}, {transform_indices = @transform_7, window_bounds = array<i64: 8, 128>}, {transform_indices = @transform_8, window_bounds = array<i64: 8, 128>}, {transform_indices = @transform_9, window_bounds = array<i64: 8, 128>}]} {
    %c0 = arith.constant 0 : index
    %c0_0 = arith.constant 0 : index
    %0 = vector.load %arg2[%c0, %c0_0] : memref<8x128xi32, #tpu.memory_space<vmem>>, vector<8x128xi32>
    %c0_1 = arith.constant 0 : index
    %c0_2 = arith.constant 0 : index
    %1 = vector.load %arg3[%c0_1, %c0_2] : memref<8x128xf32, #tpu.memory_space<vmem>>, vector<8x128xf32>
    %c0_3 = arith.constant 0 : index
    %c0_4 = arith.constant 0 : index
    %c0_5 = arith.constant 0 : index
    %2 = vector.load %arg1[%c0_3, %c0_4, %c0_5] : memref<4x8x128xf32, #tpu.memory_space<vmem>>, vector<1x8x128xf32>
    %3 = vector.shape_cast %2 : vector<1x8x128xf32> to vector<8x128xf32>
    %c1 = arith.constant 1 : index
    %c0_6 = arith.constant 0 : index
    %c0_7 = arith.constant 0 : index
    %4 = vector.load %arg1[%c1, %c0_6, %c0_7] : memref<4x8x128xf32, #tpu.memory_space<vmem>>, vector<1x8x128xf32>
    %5 = vector.shape_cast %4 : vector<1x8x128xf32> to vector<8x128xf32>
    %c2 = arith.constant 2 : index
    %c0_8 = arith.constant 0 : index
    %c0_9 = arith.constant 0 : index
    %6 = vector.load %arg1[%c2, %c0_8, %c0_9] : memref<4x8x128xf32, #tpu.memory_space<vmem>>, vector<1x8x128xf32>
    %7 = vector.shape_cast %6 : vector<1x8x128xf32> to vector<8x128xf32>
    %c3 = arith.constant 3 : index
    %c0_10 = arith.constant 0 : index
    %c0_11 = arith.constant 0 : index
    %8 = vector.load %arg1[%c3, %c0_10, %c0_11] : memref<4x8x128xf32, #tpu.memory_space<vmem>>, vector<1x8x128xf32>
    %9 = vector.shape_cast %8 : vector<1x8x128xf32> to vector<8x128xf32>
    %10 = arith.maximumf %3, %5 : vector<8x128xf32>
    %11 = arith.maximumf %10, %7 : vector<8x128xf32>
    %12 = arith.maximumf %11, %9 : vector<8x128xf32>
    %13 = arith.maximumf %5, %7 : vector<8x128xf32>
    %14 = arith.maximumf %13, %9 : vector<8x128xf32>
    %cst = arith.constant 0.000000e+00 : f32
    %15 = vector.broadcast %cst : f32 to vector<8x128xf32>
    %cst_12 = arith.constant 0.000000e+00 : f32
    %16 = vector.broadcast %cst_12 : f32 to vector<8x128xf32>
    %17 = arith.subf %3, %12 : vector<8x128xf32>
    %18 = math.exp %17 : vector<8x128xf32>
    %19 = arith.addf %15, %18 : vector<8x128xf32>
    %c0_i32 = arith.constant 0 : i32
    %20 = vector.broadcast %c0_i32 : i32 to vector<8x128xi32>
    %21 = arith.cmpi eq, %0, %20 : vector<8x128xi32>
    %cst_13 = arith.constant 0.000000e+00 : f32
    %22 = vector.broadcast %cst_13 : f32 to vector<8x128xf32>
    %23 = arith.select %21, %3, %22 : vector<8x128xi1>, vector<8x128xf32>
    %24 = arith.addf %16, %23 : vector<8x128xf32>
    %25 = arith.subf %5, %12 : vector<8x128xf32>
    %26 = math.exp %25 : vector<8x128xf32>
    %27 = arith.addf %19, %26 : vector<8x128xf32>
    %c1_i32 = arith.constant 1 : i32
    %28 = vector.broadcast %c1_i32 : i32 to vector<8x128xi32>
    %29 = arith.cmpi eq, %0, %28 : vector<8x128xi32>
    %cst_14 = arith.constant 0.000000e+00 : f32
    %30 = vector.broadcast %cst_14 : f32 to vector<8x128xf32>
    %31 = arith.select %29, %5, %30 : vector<8x128xi1>, vector<8x128xf32>
    %32 = arith.addf %24, %31 : vector<8x128xf32>
    %33 = arith.subf %7, %12 : vector<8x128xf32>
    %34 = math.exp %33 : vector<8x128xf32>
    %35 = arith.addf %27, %34 : vector<8x128xf32>
    %c2_i32 = arith.constant 2 : i32
    %36 = vector.broadcast %c2_i32 : i32 to vector<8x128xi32>
    %37 = arith.cmpi eq, %0, %36 : vector<8x128xi32>
    %cst_15 = arith.constant 0.000000e+00 : f32
    %38 = vector.broadcast %cst_15 : f32 to vector<8x128xf32>
    %39 = arith.select %37, %7, %38 : vector<8x128xi1>, vector<8x128xf32>
    %40 = arith.addf %32, %39 : vector<8x128xf32>
    %41 = arith.subf %9, %12 : vector<8x128xf32>
    %42 = math.exp %41 : vector<8x128xf32>
    %43 = arith.addf %35, %42 : vector<8x128xf32>
    %c3_i32 = arith.constant 3 : i32
    %44 = vector.broadcast %c3_i32 : i32 to vector<8x128xi32>
    %45 = arith.cmpi eq, %0, %44 : vector<8x128xi32>
    %cst_16 = arith.constant 0.000000e+00 : f32
    %46 = vector.broadcast %cst_16 : f32 to vector<8x128xf32>
    %47 = arith.select %45, %9, %46 : vector<8x128xi1>, vector<8x128xf32>
    %48 = arith.addf %40, %47 : vector<8x128xf32>
    %49 = math.log %43 : vector<8x128xf32>
    %50 = arith.addf %12, %49 : vector<8x128xf32>
    %c0_i32_17 = arith.constant 0 : i32
    %51 = vector.broadcast %c0_i32_17 : i32 to vector<8x128xi32>
    %52 = arith.cmpi eq, %0, %51 : vector<8x128xi32>
    %cst_18 = arith.constant 1.000000e+00 : f32
    %cst_19 = arith.constant 2.000000e+00 : f32
    %53 = vector.broadcast %cst_18 : f32 to vector<8x128xf32>
    %54 = vector.broadcast %cst_19 : f32 to vector<8x128xf32>
    %55 = arith.select %52, %53, %54 : vector<8x128xi1>, vector<8x128xf32>
    %56 = arith.subf %50, %48 : vector<8x128xf32>
    %57 = arith.mulf %55, %56 : vector<8x128xf32>
    %c0_20 = arith.constant 0 : index
    %c0_21 = arith.constant 0 : index
    %58 = vector.load %arg6[%c0_20, %c0_21] : memref<8x128xf32, #tpu.memory_space<vmem>>, vector<8x128xf32>
    tpu.vector_store %arg6[%c0_20, %c0_21], %57 {strides = array<i32>} : memref<8x128xf32, #tpu.memory_space<vmem>>, vector<8x128xf32>,
    %59 = arith.cmpf oge, %3, %14 : vector<8x128xf32>
    %c0_i32_22 = arith.constant 0 : i32
    %60 = vector.broadcast %c0_i32_22 : i32 to vector<8x128xi32>
    %61 = arith.cmpi sgt, %0, %60 : vector<8x128xi32>
    %62 = arith.extui %61 : vector<8x128xi1> to vector<8x128xi32>
    %63 = arith.sitofp %62 : vector<8x128xi32> to vector<8x128xf32>
    %64 = arith.mulf %63, %1 : vector<8x128xf32>
    %cst_23 = arith.constant dense<true> : vector<8x128xi1>
    %65 = arith.xori %59, %cst_23 : vector<8x128xi1>
    %66 = arith.extui %65 : vector<8x128xi1> to vector<8x128xi32>
    %67 = arith.sitofp %66 : vector<8x128xi32> to vector<8x128xf32>
    %68 = arith.mulf %67, %1 : vector<8x128xf32>
    %c0_i32_24 = arith.constant 0 : i32
    %69 = vector.broadcast %c0_i32_24 : i32 to vector<8x128xi32>
    %70 = arith.cmpi eq, %0, %69 : vector<8x128xi32>
    %71 = arith.andi %70, %59 : vector<8x128xi1>
    %cst_25 = arith.constant 5.000000e-01 : f32
    %72 = vector.broadcast %cst_25 : f32 to vector<8x128xf32>
    %73 = arith.cmpf ogt, %1, %72 : vector<8x128xf32>
    %74 = arith.andi %71, %73 : vector<8x128xi1>
    %75 = arith.subf %3, %14 : vector<8x128xf32>
    %76 = math.absf %75 : vector<8x128xf32>
    %cst_26 = arith.constant 0x7F800000 : f32
    %77 = vector.broadcast %cst_26 : f32 to vector<8x128xf32>
    %78 = arith.select %74, %76, %77 : vector<8x128xi1>, vector<8x128xf32>
    %c0_27 = arith.constant 0 : index
    %c0_28 = arith.constant 0 : index
    %79 = vector.load %arg7[%c0_27, %c0_28] : memref<8x128xf32, #tpu.memory_space<vmem>>, vector<8x128xf32>
    tpu.vector_store %arg7[%c0_27, %c0_28], %78 {strides = array<i32>} : memref<8x128xf32, #tpu.memory_space<vmem>>, vector<8x128xf32>,
    %80 = arith.maximumf %64, %68 : vector<8x128xf32>
    %c0_29 = arith.constant 0 : index
    %c0_30 = arith.constant 0 : index
    %81 = vector.load %arg8[%c0_29, %c0_30] : memref<8x128xf32, #tpu.memory_space<vmem>>, vector<8x128xf32>
    tpu.vector_store %arg8[%c0_29, %c0_30], %80 {strides = array<i32>} : memref<8x128xf32, #tpu.memory_space<vmem>>, vector<8x128xf32>,
    %cst_31 = arith.constant 0.000000e+00 : f32
    %82 = vector.broadcast %cst_31 : f32 to vector<8x128xf32>
    %c0_32 = arith.constant 0 : index
    %c0_33 = arith.constant 0 : index
    %c0_34 = arith.constant 0 : index
    %83 = vector.load %arg4[%c0_32, %c0_33, %c0_34] : memref<4x8x128xf32, #tpu.memory_space<vmem>>, vector<1x8x128xf32>
    %84 = vector.shape_cast %83 : vector<1x8x128xf32> to vector<8x128xf32>
    %c0_35 = arith.constant 0 : index
    %c0_36 = arith.constant 0 : index
    %c0_37 = arith.constant 0 : index
    %85 = vector.load %arg5[%c0_35, %c0_36, %c0_37] : memref<4x8x128xf32, #tpu.memory_space<vmem>>, vector<1x8x128xf32>
    %86 = vector.shape_cast %85 : vector<1x8x128xf32> to vector<8x128xf32>
    %87 = arith.subf %84, %86 : vector<8x128xf32>
    %88 = math.absf %87 : vector<8x128xf32>
    %cst_38 = arith.constant 1.000000e+00 : f32
    %89 = vector.broadcast %cst_38 : f32 to vector<8x128xf32>
    %90 = arith.cmpf olt, %88, %89 : vector<8x128xf32>
    %cst_39 = arith.constant 5.000000e-01 : f32
    %91 = vector.broadcast %cst_39 : f32 to vector<8x128xf32>
    %92 = arith.mulf %91, %87 : vector<8x128xf32>
    %93 = arith.mulf %92, %87 : vector<8x128xf32>
    %cst_40 = arith.constant 5.000000e-01 : f32
    %94 = vector.broadcast %cst_40 : f32 to vector<8x128xf32>
    %95 = arith.subf %88, %94 : vector<8x128xf32>
    %96 = arith.select %90, %93, %95 : vector<8x128xi1>, vector<8x128xf32>
    %97 = arith.addf %82, %96 : vector<8x128xf32>
    %c1_41 = arith.constant 1 : index
    %c0_42 = arith.constant 0 : index
    %c0_43 = arith.constant 0 : index
    %98 = vector.load %arg4[%c1_41, %c0_42, %c0_43] : memref<4x8x128xf32, #tpu.memory_space<vmem>>, vector<1x8x128xf32>
    %99 = vector.shape_cast %98 : vector<1x8x128xf32> to vector<8x128xf32>
    %c1_44 = arith.constant 1 : index
    %c0_45 = arith.constant 0 : index
    %c0_46 = arith.constant 0 : index
    %100 = vector.load %arg5[%c1_44, %c0_45, %c0_46] : memref<4x8x128xf32, #tpu.memory_space<vmem>>, vector<1x8x128xf32>
    %101 = vector.shape_cast %100 : vector<1x8x128xf32> to vector<8x128xf32>
    %102 = arith.subf %99, %101 : vector<8x128xf32>
    %103 = math.absf %102 : vector<8x128xf32>
    %cst_47 = arith.constant 1.000000e+00 : f32
    %104 = vector.broadcast %cst_47 : f32 to vector<8x128xf32>
    %105 = arith.cmpf olt, %103, %104 : vector<8x128xf32>
    %cst_48 = arith.constant 5.000000e-01 : f32
    %106 = vector.broadcast %cst_48 : f32 to vector<8x128xf32>
    %107 = arith.mulf %106, %102 : vector<8x128xf32>
    %108 = arith.mulf %107, %102 : vector<8x128xf32>
    %cst_49 = arith.constant 5.000000e-01 : f32
    %109 = vector.broadcast %cst_49 : f32 to vector<8x128xf32>
    %110 = arith.subf %103, %109 : vector<8x128xf32>
    %111 = arith.select %105, %108, %110 : vector<8x128xi1>, vector<8x128xf32>
    %112 = arith.addf %97, %111 : vector<8x128xf32>
    %c2_50 = arith.constant 2 : index
    %c0_51 = arith.constant 0 : index
    %c0_52 = arith.constant 0 : index
    %113 = vector.load %arg4[%c2_50, %c0_51, %c0_52] : memref<4x8x128xf32, #tpu.memory_space<vmem>>, vector<1x8x128xf32>
    %114 = vector.shape_cast %113 : vector<1x8x128xf32> to vector<8x128xf32>
    %c2_53 = arith.constant 2 : index
    %c0_54 = arith.constant 0 : index
    %c0_55 = arith.constant 0 : index
    %115 = vector.load %arg5[%c2_53, %c0_54, %c0_55] : memref<4x8x128xf32, #tpu.memory_space<vmem>>, vector<1x8x128xf32>
    %116 = vector.shape_cast %115 : vector<1x8x128xf32> to vector<8x128xf32>
    %117 = arith.subf %114, %116 : vector<8x128xf32>
    %118 = math.absf %117 : vector<8x128xf32>
    %cst_56 = arith.constant 1.000000e+00 : f32
    %119 = vector.broadcast %cst_56 : f32 to vector<8x128xf32>
    %120 = arith.cmpf olt, %118, %119 : vector<8x128xf32>
    %cst_57 = arith.constant 5.000000e-01 : f32
    %121 = vector.broadcast %cst_57 : f32 to vector<8x128xf32>
    %122 = arith.mulf %121, %117 : vector<8x128xf32>
    %123 = arith.mulf %122, %117 : vector<8x128xf32>
    %cst_58 = arith.constant 5.000000e-01 : f32
    %124 = vector.broadcast %cst_58 : f32 to vector<8x128xf32>
    %125 = arith.subf %118, %124 : vector<8x128xf32>
    %126 = arith.select %120, %123, %125 : vector<8x128xi1>, vector<8x128xf32>
    %127 = arith.addf %112, %126 : vector<8x128xf32>
    %c3_59 = arith.constant 3 : index
    %c0_60 = arith.constant 0 : index
    %c0_61 = arith.constant 0 : index
    %128 = vector.load %arg4[%c3_59, %c0_60, %c0_61] : memref<4x8x128xf32, #tpu.memory_space<vmem>>, vector<1x8x128xf32>
    %129 = vector.shape_cast %128 : vector<1x8x128xf32> to vector<8x128xf32>
    %c3_62 = arith.constant 3 : index
    %c0_63 = arith.constant 0 : index
    %c0_64 = arith.constant 0 : index
    %130 = vector.load %arg5[%c3_62, %c0_63, %c0_64] : memref<4x8x128xf32, #tpu.memory_space<vmem>>, vector<1x8x128xf32>
    %131 = vector.shape_cast %130 : vector<1x8x128xf32> to vector<8x128xf32>
    %132 = arith.subf %129, %131 : vector<8x128xf32>
    %133 = math.absf %132 : vector<8x128xf32>
    %cst_65 = arith.constant 1.000000e+00 : f32
    %134 = vector.broadcast %cst_65 : f32 to vector<8x128xf32>
    %135 = arith.cmpf olt, %133, %134 : vector<8x128xf32>
    %cst_66 = arith.constant 5.000000e-01 : f32
    %136 = vector.broadcast %cst_66 : f32 to vector<8x128xf32>
    %137 = arith.mulf %136, %132 : vector<8x128xf32>
    %138 = arith.mulf %137, %132 : vector<8x128xf32>
    %cst_67 = arith.constant 5.000000e-01 : f32
    %139 = vector.broadcast %cst_67 : f32 to vector<8x128xf32>
    %140 = arith.subf %133, %139 : vector<8x128xf32>
    %141 = arith.select %135, %138, %140 : vector<8x128xi1>, vector<8x128xf32>
    %142 = arith.addf %127, %141 : vector<8x128xf32>
    %143 = arith.mulf %142, %64 : vector<8x128xf32>
    %144 = vector.shape_cast %64 : vector<8x128xf32> to vector<1x8x128xf32>
    %cst_68 = arith.constant dense<0.000000e+00> : vector<8x128xf32>
    %145 = vector.multi_reduction <add>, %144, %cst_68 [0] : vector<1x8x128xf32> to vector<8x128xf32>
    %c0_69 = arith.constant 0 : index
    %c0_70 = arith.constant 0 : index
    %146 = vector.load %arg9[%c0_69, %c0_70] : memref<8x128xf32, #tpu.memory_space<vmem>>, vector<8x128xf32>
    tpu.vector_store %arg9[%c0_69, %c0_70], %145 {strides = array<i32>} : memref<8x128xf32, #tpu.memory_space<vmem>>, vector<8x128xf32>,
    %147 = vector.shape_cast %143 : vector<8x128xf32> to vector<1x8x128xf32>
    %cst_71 = arith.constant dense<0.000000e+00> : vector<8x128xf32>
    %148 = vector.multi_reduction <add>, %147, %cst_71 [0] : vector<1x8x128xf32> to vector<8x128xf32>
    %c0_72 = arith.constant 0 : index
    %c0_73 = arith.constant 0 : index
    %149 = vector.load %arg10[%c0_72, %c0_73] : memref<8x128xf32, #tpu.memory_space<vmem>>, vector<8x128xf32>
    tpu.vector_store %arg10[%c0_72, %c0_73], %148 {strides = array<i32>} : memref<8x128xf32, #tpu.memory_space<vmem>>, vector<8x128xf32>,
    return
  }
  func.func @transform_0(%arg0: i32) -> (i32, i32, i32) {
    %c0_i32 = arith.constant 0 : i32
    %c0_i32_0 = arith.constant 0 : i32
    %c0_i32_1 = arith.constant 0 : i32
    return %c0_i32, %arg0, %c0_i32_0 : i32, i32, i32
  }
  func.func @transform_1(%arg0: i32) -> (i32, i32) {
    %c0_i32 = arith.constant 0 : i32
    %c0_i32_0 = arith.constant 0 : i32
    return %arg0, %c0_i32 : i32, i32
  }
  func.func @transform_2(%arg0: i32) -> (i32, i32) {
    %c0_i32 = arith.constant 0 : i32
    %c0_i32_0 = arith.constant 0 : i32
    return %arg0, %c0_i32 : i32, i32
  }
  func.func @transform_3(%arg0: i32) -> (i32, i32, i32) {
    %c0_i32 = arith.constant 0 : i32
    %c0_i32_0 = arith.constant 0 : i32
    %c0_i32_1 = arith.constant 0 : i32
    return %c0_i32, %arg0, %c0_i32_0 : i32, i32, i32
  }
  func.func @transform_4(%arg0: i32) -> (i32, i32, i32) {
    %c0_i32 = arith.constant 0 : i32
    %c0_i32_0 = arith.constant 0 : i32
    %c0_i32_1 = arith.constant 0 : i32
    return %c0_i32, %arg0, %c0_i32_0 : i32, i32, i32
  }
  func.func @transform_5(%arg0: i32) -> (i32, i32) {
    %c0_i32 = arith.constant 0 : i32
    %c0_i32_0 = arith.constant 0 : i32
    return %arg0, %c0_i32 : i32, i32
  }
  func.func @transform_6(%arg0: i32) -> (i32, i32) {
    %c0_i32 = arith.constant 0 : i32
    %c0_i32_0 = arith.constant 0 : i32
    return %arg0, %c0_i32 : i32, i32
  }
  func.func @transform_7(%arg0: i32) -> (i32, i32) {
    %c0_i32 = arith.constant 0 : i32
    %c0_i32_0 = arith.constant 0 : i32
    return %arg0, %c0_i32 : i32, i32
  }
  func.func @transform_8(%arg0: i32) -> (i32, i32) {
    %c0_i32 = arith.constant 0 : i32
    %c0_i32_0 = arith.constant 0 : i32
    return %arg0, %c0_i32 : i32, i32
  }
  func.func @transform_9(%arg0: i32) -> (i32, i32) {
    %c0_i32 = arith.constant 0 : i32
    %c0_i32_0 = arith.constant 0 : i32
    return %arg0, %c0_i32 : i32, i32
  }
}

</mosaic_0001>

<bundles_post_ra>
// kernel: tpu_custom_call.1
= control target key start
LH: loop header
LB: loop body
LE: loop exit
PB: predicated region body
PF: predicated region fallthrough
CT: control target
= control target key end

     0   :  { %15 = vsyncpa [#allocation3], 0  ;;  %s857_s0 = inlined_call_operand.hbm [shape: f32[4,8,128], index: 0, kind: input, shape index: {}]   ;;  %s858_s1 = inlined_call_operand.hbm [shape: s32[8,128], index: 1, kind: input, shape index: {}]   ;;  %s859_s2 = inlined_call_operand.hbm [shape: f32[8,128], index: 2, kind: input, shape index: {}]   ;;  %s860_s3 = inlined_call_operand.hbm [shape: f32[4,8,128], index: 3, kind: input, shape index: {}]   ;;  %s861_s4 = inlined_call_operand.hbm [shape: f32[4,8,128], index: 4, kind: input, shape index: {}]   ;;  %s862_s5 = inlined_call_operand.hbm [shape: f32[8,128], index: 5, kind: output, shape index: {0}]   ;;  %s863_s6 = inlined_call_operand.hbm [shape: f32[8,128], index: 6, kind: output, shape index: {1}]   ;;  %s864_s7 = inlined_call_operand.hbm [shape: f32[8,128], index: 7, kind: output, shape index: {2}]   ;;  %s865_s8 = inlined_call_operand.hbm [shape: f32[8,128], index: 8, kind: output, shape index: {3}]   ;;  %s866_s9 = inlined_call_operand.hbm [shape: f32[8,128], index: 9, kind: output, shape index: {4}]  }
   0x1   :  { %16 = vsyncpa [#allocation6], 0 }
   0x2   :  { %17 = vsyncpa [#allocation9], 0 }
   0x3   :  { %18 = vsyncpa [#allocation4], 0 }
   0x4   :  { %19 = vsyncpa [#allocation13], 0 }
   0x5   :  { %20 = vsyncpa [#allocation16], 0  ;;  %s544_s30 = smov [#allocation5]   ;;  %s312_s13 = scalar_lea.hbm %s858_s1, 128 }
   0x6   :  { %s39_s10 = sshll.u32 %s544_s30, 4  ;;  %p313_p0 = scmp.ne.s32.totalorder %s858_s1, %s312_s13  ;;  %s40_s10 = int_to_ptr.vmem [resolvable:$true] %s39_s10 }
   0x7   :  { %p316_p1 = scmp.lt.u32.totalorder %s312_s13, %s858_s1 }
   0x9   :  { %p318_p2 = pnand %p316_p1, %p313_p0 }
   0xb   :  { %321 = shalt.err (!%p318_p2)
}
   0xc   :  { %s322_s18 = scalar_lea.vmem %s40_s10, 128  ;;  %p327_p4 = scmp.lt.s32.totalorder %s40_s10, %s40_s10 }
   0xd   :  { %p323_p3 = scmp.ne.s32.totalorder %s40_s10, %s322_s18  ;;  %p328_p5 = scmp.lt.s32.totalorder %s322_s18, %s322_s18 }
   0xf   :  { %p329_p6 = por %p328_p5, %p327_p4 }
  0x11   :  { %p330_p7 = pnand %p329_p6, %p323_p3 }
  0x13   :  { %333 = shalt.err (!%p330_p7)
}
  0x14   :  { %42 = dma.hbm_to_vmem [thread:$0]  %s858_s1, 128, %s40_s10, [#allocation6]  }
  0x15   :  { %s545_s21 = smov [#allocation8]   ;;  %s546_s23 = smov [#allocation2]  }
  0x16   :  { %s58_s22 = sshll.u32 %s545_s21, 4  ;;  %s26_s24 = sshll.u32 %s546_s23, 4  ;;  %s59_s22 = int_to_ptr.vmem [resolvable:$true] %s58_s22  ;;  %s27_s24 = int_to_ptr.vmem [resolvable:$true] %s26_s24 }
  0x17   :  { %s334_s27 = scalar_lea.hbm %s860_s3, 512 }
  0x18   :  { %p335_p8 = scmp.ne.s32.totalorder %s860_s3, %s334_s27  ;;  %p338_p9 = scmp.lt.u32.totalorder %s334_s27, %s860_s3 }
  0x1a   :  { %p340_p10 = pnand %p338_p9, %p335_p8 }
  0x1c   :  { %343 = shalt.err (!%p340_p10)
}
  0x1d   :  { %s344_s1 = scalar_lea.vmem %s59_s22, 512  ;;  %p349_p12 = scmp.lt.s32.totalorder %s59_s22, %s59_s22 }
  0x1e   :  { %p345_p11 = scmp.ne.s32.totalorder %s59_s22, %s344_s1  ;;  %p350_p13 = scmp.lt.s32.totalorder %s344_s1, %s344_s1 }
  0x20   :  { %p351_p0 = por %p350_p13, %p349_p12 }
  0x22   :  { %p352_p1 = pnand %p351_p0, %p345_p11 }
  0x24   :  { %355 = shalt.err (!%p352_p1)
}
  0x25   :  { %s547_s10 = smov 128   ;;  %s548_s12 = smov 8  }
  0x26   :  { %64 = dma.hbm_to_vmem [thread:$0]  %s860_s3, 512, %s59_s22, [#allocation9], %s547_s10, %s547_s10, %s548_s12  }
  0x27   :  { %s356_s17 = scalar_lea.hbm %s857_s0, 512 }
  0x28   :  { %p357_p2 = scmp.ne.s32.totalorder %s857_s0, %s356_s17  ;;  %p360_p3 = scmp.lt.u32.totalorder %s356_s17, %s857_s0 }
  0x2a   :  { %p362_p4 = pnand %p360_p3, %p357_p2 }
  0x2c   :  { %365 = shalt.err (!%p362_p4)
}
  0x2d   :  { %s366_s23 = scalar_lea.vmem %s27_s24, 512  ;;  %p371_p6 = scmp.lt.s32.totalorder %s27_s24, %s27_s24 }
  0x2e   :  { %p367_p5 = scmp.ne.s32.totalorder %s27_s24, %s366_s23  ;;  %p372_p7 = scmp.lt.s32.totalorder %s366_s23, %s366_s23 }
  0x30   :  { %p373_p8 = por %p372_p7, %p371_p6 }
  0x32   :  { %p374_p9 = pnand %p373_p8, %p367_p5 }
  0x34   :  { %377 = shalt.err (!%p374_p9)
}
  0x35   :  { %32 = dma.hbm_to_vmem [thread:$0]  %s857_s0, 512, %s27_s24, [#allocation3], %s547_s10, %s547_s10, %s548_s12  }
  0x36   :  { %s549_s25 = smov [#allocation7]   ;;  %s550_s27 = smov [#allocation10]  }
  0x37   :  { %s49_s26 = sshll.u32 %s549_s25, 4  ;;  %s70_s28 = sshll.u32 %s550_s27, 4  ;;  %s50_s26 = int_to_ptr.vmem [resolvable:$true] %s49_s26  ;;  %s71_s28 = int_to_ptr.vmem [resolvable:$true] %s70_s28 }
  0x38   :  { %s378_s11 = scalar_lea.hbm %s859_s2, 128 }
  0x39   :  { %p379_p10 = scmp.ne.s32.totalorder %s859_s2, %s378_s11  ;;  %p382_p11 = scmp.lt.u32.totalorder %s378_s11, %s859_s2 }
  0x3b   :  { %p384_p12 = pnand %p382_p11, %p379_p10 }
  0x3d   :  { %387 = shalt.err (!%p384_p12)
}
  0x3e   :  { %s388_s0 = scalar_lea.vmem %s50_s26, 128  ;;  %p393_p0 = scmp.lt.s32.totalorder %s50_s26, %s50_s26 }
  0x3f   :  { %p389_p13 = scmp.ne.s32.totalorder %s50_s26, %s388_s0  ;;  %p394_p1 = scmp.lt.s32.totalorder %s388_s0, %s388_s0 }
  0x41   :  { %p395_p2 = por %p394_p1, %p393_p0 }
  0x43   :  { %p396_p3 = pnand %p395_p2, %p389_p13 }
  0x45   :  { %399 = shalt.err (!%p396_p3)
}
  0x46   :  { %52 = dma.hbm_to_vmem [thread:$0]  %s859_s2, 128, %s50_s26, [#allocation6]  }
  0x47   :  { %s400_s19 = scalar_lea.hbm %s861_s4, 512 }
  0x48   :  { %p401_p4 = scmp.ne.s32.totalorder %s861_s4, %s400_s19  ;;  %p404_p5 = scmp.lt.u32.totalorder %s400_s19, %s861_s4 }
  0x4a   :  { %p406_p6 = pnand %p404_p5, %p401_p4 }
  0x4c   :  { %409 = shalt.err (!%p406_p6)
}
  0x4d   :  { %s410_s22 = scalar_lea.vmem %s71_s28, 512  ;;  %p415_p8 = scmp.lt.s32.totalorder %s71_s28, %s71_s28 }
  0x4e   :  { %p411_p7 = scmp.ne.s32.totalorder %s71_s28, %s410_s22  ;;  %p416_p9 = scmp.lt.s32.totalorder %s410_s22, %s410_s22 }
  0x50   :  { %p417_p10 = por %p416_p9, %p415_p8 }
  0x52   :  { %p418_p11 = pnand %p417_p10, %p411_p7 }
  0x54   :  { %421 = shalt.err (!%p418_p11)
}
  0x55   :  { %76 = dma.hbm_to_vmem [thread:$0]  %s861_s4, 512, %s71_s28, [#allocation9], %s547_s10, %s547_s10, %s548_s12  }
  0x56   :  { %532 = dma.done.wait [#allocation3], 512  }
  0x57   :  { %533 = vsyncadd [#allocation3], 4294966784 }
  0x58   :  { %534 = dma.done.wait [#allocation6], 256  }
  0x59   :  { %535 = vsyncadd [#allocation6], 4294967040 }
  0x5a   :  { %536 = dma.done.wait [#allocation9], 1024  }
  0x5b   :  { %537 = vsyncadd [#allocation9], 4294966272  ;;  %v678_v0 = vld [vmem:[#allocation5] sm:$0xff]  ;;  %v682_v2 = vld [vmem:[#allocation7] sm:$0xff]  ;;  %s551_s4 = smov [#allocation15]   ;;  %v552_v15 = vmov 0.0  }
  0x5c   :  { %v680_v1 = vld [vmem:[#allocation2] sm:$0xff]  ;;  %v684_v3 = vld [vmem:[#allocation2 + $0x8] sm:$0xff]  ;;  %v686_v4 = vld [vmem:[#allocation2 + $0x10] sm:$0xff]  ;;  %s246_s10 = sshll.u32 %s551_s4, 4  ;;  %vm142_vm0 = vcmp.gt.s32.totalorder %v678_v0, 0  ;;  %vm151_vm1 = vcmp.gt.f32.partialorder %v682_v2, 0.5  ;;  %s701_s10 = int_to_ptr.vmem [resolvable:$true] %s246_s10 }
  0x5d   :  { %v688_v5 = vld [vmem:[#allocation2 + $0x18] sm:$0xff]  ;;  %v101_v6 = vmax.f32 %v680_v1, %v684_v3  ;;  %v104_v7 = vmax.f32 %v684_v3, %v686_v4  ;;  %v159_v8 = vld [vmem:[#allocation8] sm:$0xff]  ;;  %v182_v12 = vld [vmem:[#allocation8 + $0x10] sm:$0xff]  ;;  %v281_v16 = vsel %vm142_vm0, 1.0, %v552_v15  ;;  %vm110_vm3 = vcmp.eq.s32.totalorder %v678_v0, 0  ;;  %s554_s12 = smov [#allocation12]   ;;  %p427_p13 = scmp.lt.s32.totalorder %s701_s10, %s701_s10 }
  0x5e   :  { %v160_v9 = vld [vmem:[#allocation10] sm:$0xff]  ;;  %v170_v10 = vld [vmem:[#allocation8 + $0x8] sm:$0xff]  ;;  %v184_v17 = vld [vmem:[#allocation10 + $0x10] sm:$0xff]  ;;  %v699_v20 = vmul.f32 %v281_v16, %v682_v2  ;;  %vm553_vm4 = vmmov 1   ;;  %s226_s26 = sshll.u32 %s554_s12, 4  ;;  %s555_s27 = smov [#allocation14]   ;;  %s227_s26 = int_to_ptr.vmem [resolvable:$true] %s226_s26 }
  0x5f   :  { %v172_v11 = vld [vmem:[#allocation10 + $0x8] sm:$0xff]  ;;  %v102_v13 = vmax.f32 %v101_v6, %v686_v4  ;;  %v105_v14 = vmax.f32 %v104_v7, %v688_v5  ;;  %v194_v18 = vld [vmem:[#allocation8 + $0x18] sm:$0xff]  ;;  %v161_v23 = vsub.f32 %v159_v8, %v160_v9  ;;  %v718_v26 = vsub.f32 %v182_v12, %v184_v17  ;;  %s722_s28 = sshll.u32 %s555_s27, 4  ;;  %s422_s29 = scalar_lea.vmem %s701_s10, 128  ;;  %s765_s28 = int_to_ptr.vmem [resolvable:$true] %s722_s28 }
  0x60   :  { %v196_v19 = vld [vmem:[#allocation10 + $0x18] sm:$0xff]  ;;  %207 = vst [vmem:[#allocation15] sm:$0xff] %v699_v20  ;;  %v716_v25 = vsub.f32 %v170_v10, %v172_v11  ;;  %p423_p12 = scmp.ne.s32.totalorder %s701_s10, %s422_s29  ;;  %p428_p0 = scmp.lt.s32.totalorder %s422_s29, %s422_s29 }
  0x61   :  { %v704_v21 = vmax.f32 %v102_v13, %v688_v5  ;;  %vm141_vm2 = vcmp.ge.f32.partialorder %v680_v1, %v105_v14  ;;  %v153_v22 = vsub.f32 %v680_v1, %v105_v14  ;;  %v720_v27 = vsub.f32 %v194_v18, %v196_v19 }
  0x62   :  { %vm711_vm5 = vmxor %vm141_vm2, %vm553_vm4  ;;  %p429_p1 = por %p428_p0, %p427_p13 }
  0x63   :  { %v106_v28 = vsub.f32 %v680_v1, %v704_v21  ;;  %v113_v29 = vsub.f32 %v684_v3, %v704_v21  ;;  %v120_v30 = vsub.f32 %v686_v4, %v704_v21  ;;  %v127_v31 = vsub.f32 %v688_v5, %v704_v21  ;;  %vm150_vm6 = vmand %vm110_vm3, %vm141_vm2 }
  0x64   :  { %p430_p2 = pnand %p429_p1, %p423_p12 }
  0x66   :  { %433 = shalt.err (!%p430_p2)
}
  0x67   :  { %s434_s1 = scalar_lea.hbm %s865_s8, 128 }
  0x68   :  { %p435_p3 = scmp.ne.s32.totalorder %s865_s8, %s434_s1  ;;  %p438_p4 = scmp.lt.u32.totalorder %s434_s1, %s865_s8 }
  0x6a   :  { %p440_p5 = pnand %p438_p4, %p435_p3 }
  0x6c   :  { %443 = shalt.err (!%p440_p5)
}
  0x6d   :  { %249 = dma.vmem_to_hbm [thread:$0]  %s701_s10, 128, %s865_s8, [#allocation16]   ;;  %vm152_vm7 = vmand %vm150_vm6, %vm151_vm1  ;;  %v154_v32 = vand.u32 2147483647, %v153_v22  ;;  %v282_v33 = vsel %vm711_vm5, 1.0, %v552_v15  ;;  %v164_v35 = vmul.f32 0.5, %v161_v23 }
  0x6e   :  { %v162_v34 = vand.u32 2147483647, %v161_v23  ;;  %v107_v36 = vmul.f32 1.442695, %v106_v28  ;;  %v114_v37 = vmul.f32 1.442695, %v113_v29  ;;  %v149_v39 = vmul.f32 %v282_v33, %v682_v2  ;;  %p449_p7 = scmp.lt.s32.totalorder %s227_s26, %s227_s26 }
  0x6f   :  { %v121_v38 = vmul.f32 1.442695, %v120_v30  ;;  %v128_v40 = vmul.f32 1.442695, %v127_v31  ;;  %v155_v41 = vsel %vm152_vm7, %v154_v32, inf  ;;  %v165_v43 = vmul.f32 %v164_v35, %v161_v23  ;;  %s444_s8 = scalar_lea.vmem %s227_s26, 128 }
  0x70   :  { %vm758_vm8 = vcmp.lt.f32.partialorder %v162_v34, 1.0  ;;  %302 = vpow2.f32 %v107_v36  ;;  %156 = vst [vmem:[#allocation12] sm:$0xff] %v155_v41  ;;  %v157_v44 = vmax.f32 %v699_v20, %v149_v39  ;;  %v283_v45 = vadd.f32 -0.5, %v162_v34  ;;  %p445_p6 = scmp.ne.s32.totalorder %s227_s26, %s444_s8  ;;  %p450_p8 = scmp.lt.s32.totalorder %s444_s8, %s444_s8 }
  0x71   :  { %v174_v46 = vand.u32 2147483647, %v716_v25  ;;  %304 = vpow2.f32 %v114_v37  ;;  %v176_v47 = vmul.f32 0.5, %v716_v25  ;;  %v186_v48 = vand.u32 2147483647, %v718_v26 }
  0x72   :  { %v188_v49 = vmul.f32 0.5, %v718_v26  ;;  %p451_p9 = por %p450_p8, %p449_p7 }
  0x74   :  { %p452_p10 = pnand %p451_p9, %p445_p6 }
  0x76   :  { %455 = shalt.err (!%p452_p10)
}
  0x77   :  { %s456_s19 = scalar_lea.hbm %s863_s6, 128 }
  0x78   :  { %p457_p11 = scmp.ne.s32.totalorder %s863_s6, %s456_s19  ;;  %p460_p12 = scmp.lt.u32.totalorder %s456_s19, %s863_s6 }
  0x7a   :  { %p462_p13 = pnand %p460_p12, %p457_p11 }
  0x7c   :  { %465 = shalt.err (!%p462_p13)
}
  0x7d   :  { %229 = dma.vmem_to_hbm [thread:$0]  %s227_s26, 128, %s863_s6, [#allocation13]   ;;  %306 = vpow2.f32 %v121_v38  ;;  %158 = vst [vmem:[#allocation14] sm:$0xff] %v157_v44  ;;  %v167_v50 = vsel %vm758_vm8, %v165_v43, %v283_v45  ;;  %vm784_vm9 = vcmp.lt.f32.partialorder %v174_v46, 1.0  ;;  %v284_v52 = vadd.f32 -0.5, %v174_v46 }
  0x7e   :  { %308 = vpow2.f32 %v128_v40  ;;  %v177_v53 = vmul.f32 %v176_v47, %v716_v25  ;;  %vm789_vm10 = vcmp.lt.f32.partialorder %v186_v48, 1.0  ;;  %v189_v55 = vmul.f32 %v188_v49, %v718_v26  ;;  %s466_s6 = scalar_lea.vmem %s765_s28, 128  ;;  %p471_p1 = scmp.lt.s32.totalorder %s765_s28, %s765_s28 }
  0x7f   :  { %p467_p0 = scmp.ne.s32.totalorder %s765_s28, %s466_s6  ;;  %p472_p2 = scmp.lt.s32.totalorder %s466_s6, %s466_s6 }
  0x81   :  { %p473_p3 = por %p472_p2, %p471_p1 }
  0x83   :  { %p474_p4 = pnand %p473_p3, %p467_p0 }
  0x85   :  { %477 = shalt.err (!%p474_p4)
}
  0x86   :  { %s478_s10 = scalar_lea.hbm %s864_s7, 128 }
  0x87   :  { %p479_p5 = scmp.ne.s32.totalorder %s864_s7, %s478_s10  ;;  %p482_p6 = scmp.lt.u32.totalorder %s478_s10, %s864_s7 }
  0x89   :  { %p484_p7 = pnand %p482_p6, %p479_p5 }
  0x8b   :  { %487 = shalt.err (!%p484_p7)
}
  0x8c   :  { %239 = dma.vmem_to_hbm [thread:$0]  %s765_s28, 128, %s864_s7, [#allocation13]   ;;  %v285_v56 = vadd.f32 -0.5, %v186_v48  ;;  %v198_v57 = vand.u32 2147483647, %v720_v27  ;;  %v200_v58 = vmul.f32 0.5, %v720_v27  ;;  %v179_v59 = vsel %vm784_vm9, %v177_v53, %v284_v52  ;;  %v303_v7 = vpop.eup %302 }
  0x8d   :  { %v180_v60 = vadd.f32 %v179_v59, %v167_v50  ;;  %s556_s1 = smov [#allocation17]   ;;  %v305_v9 = vpop.eup %304  ;;  %vm117_vm12 = vcmp.eq.s32.totalorder %v678_v0, 1 }
  0x8e   :  { %v191_v61 = vsel %vm789_vm10, %v189_v55, %v285_v56  ;;  %vm199_vm11 = vcmp.lt.f32.partialorder %v198_v57, 1.0  ;;  %v201_v62 = vmul.f32 %v200_v58, %v720_v27  ;;  %v286_v63 = vadd.f32 -0.5, %v198_v57  ;;  %s256_s7 = sshll.u32 %s556_s1, 4  ;;  %v307_v10 = vpop.eup %306  ;;  %s257_s7 = int_to_ptr.vmem [resolvable:$true] %s256_s7 }
  0x8f   :  { %v192_v2 = vadd.f32 %v191_v61, %v180_v60  ;;  %v116_v11 = vadd.f32 %v305_v9, %v303_v7  ;;  %v309_v13 = vpop.eup %308  ;;  %s488_s28 = scalar_lea.vmem %s257_s7, 128  ;;  %p493_p9 = scmp.lt.s32.totalorder %s257_s7, %s257_s7 }
  0x90   :  { %v203_v6 = vsel %vm199_vm11, %v201_v62, %v286_v63  ;;  %p489_p8 = scmp.ne.s32.totalorder %s257_s7, %s488_s28  ;;  %p494_p10 = scmp.lt.s32.totalorder %s488_s28, %s488_s28 }
  0x91   :  { %v204_v8 = vadd.f32 %v203_v6, %v192_v2  ;;  %v123_v14 = vadd.f32 %v307_v10, %v116_v11 }
  0x92   :  { %p495_p11 = por %p494_p10, %p493_p9 }
  0x93   :  { %v205_v12 = vmul.f32 %v204_v8, %v699_v20 }
  0x94   :  { %p496_p12 = pnand %p495_p11, %p489_p8 }
  0x95   :  { %209 = vst [vmem:[#allocation17] sm:$0xff] %v205_v12 }
  0x96   :  { %499 = shalt.err (!%p496_p12)
}
  0x97   :  { %s500_s15 = scalar_lea.hbm %s866_s9, 128 }
  0x98   :  { %p501_p13 = scmp.ne.s32.totalorder %s866_s9, %s500_s15  ;;  %p504_p0 = scmp.lt.u32.totalorder %s500_s15, %s866_s9 }
  0x9a   :  { %p506_p1 = pnand %p504_p0, %p501_p13 }
  0x9c   :  { %509 = shalt.err (!%p506_p1)
}
  0x9d   :  { %259 = dma.vmem_to_hbm [thread:$0]  %s257_s7, 128, %s866_s9, [#allocation16]   ;;  %v130_v15 = vadd.f32 %v309_v13, %v123_v14  ;;  %v111_v16 = vsel %vm110_vm3, %v680_v1, 0.0  ;;  %v118_v17 = vsel %vm117_vm12, %v684_v3, 0.0  ;;  %vm124_vm13 = vcmp.eq.s32.totalorder %v678_v0, 2 }
  0x9e   :  { %v119_v18 = vadd.f32 %v118_v17, %v111_v16  ;;  %v125_v19 = vsel %vm124_vm13, %v686_v4, 0.0  ;;  %vm131_vm14 = vcmp.eq.s32.totalorder %v678_v0, 3  ;;  %v557_v26 = vmov 2.0   ;;  %s558_s9 = smov [#allocation11]  }
  0x9f   :  { %310 = vlog2.f32 %v130_v15  ;;  %v132_v22 = vsel %vm131_vm14, %v688_v5, 0.0  ;;  %v137_v3 = vsel %vm110_vm3, 1.0, %v557_v26  ;;  %s216_s19 = sshll.u32 %s558_s9, 4  ;;  %s217_s19 = int_to_ptr.vmem [resolvable:$true] %s216_s19 }
  0xa0   :  { %v126_v20 = vadd.f32 %v125_v19, %v119_v18  ;;  %s510_s20 = scalar_lea.vmem %s217_s19, 128  ;;  %p515_p3 = scmp.lt.s32.totalorder %s217_s19, %s217_s19 }
  0xa1   :  { %p511_p2 = scmp.ne.s32.totalorder %s217_s19, %s510_s20  ;;  %p516_p4 = scmp.lt.s32.totalorder %s510_s20, %s510_s20 }
  0xa2   :  { %v133_v24 = vadd.f32 %v132_v22, %v126_v20 }
  0xa3   :  { %p517_p5 = por %p516_p4, %p515_p3 }
  0xa5   :  { %p518_p6 = pnand %p517_p5, %p511_p2 }
  0xa9   :  { %v311_v23 = vpop.eup %310 }
  0xaa   :  { %v135_v25 = vmul.f32 0.6931472, %v311_v23 }
  0xac   :  { %v136_v1 = vadd.f32 %v135_v25, %v704_v21 }
  0xae   :  { %v138_v27 = vsub.f32 %v136_v1, %v133_v24 }
  0xb0   :  { %v139_v28 = vmul.f32 %v138_v27, %v137_v3 }
  0xb2   :  { %140 = vst [vmem:[#allocation11] sm:$0xff] %v139_v28 }
  0xb3   :  { %521 = shalt.err (!%p518_p6)
}
  0xb4   :  { %s522_s3 = scalar_lea.hbm %s862_s5, 128 }
  0xb5   :  { %p523_p7 = scmp.ne.s32.totalorder %s862_s5, %s522_s3  ;;  %p526_p8 = scmp.lt.u32.totalorder %s522_s3, %s862_s5 }
  0xb7   :  { %p528_p9 = pnand %p526_p8, %p523_p7 }
  0xb9   :  { %531 = shalt.err (!%p528_p9)
}
  0xba   :  { %219 = dma.vmem_to_hbm [thread:$0]  %s217_s19, 128, %s862_s5, [#allocation4]  }
  0xbb   :  { %538 = dma.done.wait [#allocation4], 128  }
  0xbc   :  { %539 = vsyncadd [#allocation4], 4294967168 }
  0xbd   :  { %540 = dma.done.wait [#allocation13], 256  }
  0xbe   :  { %541 = vsyncadd [#allocation13], 4294967040 }
  0xbf   :  { %542 = dma.done.wait [#allocation16], 256  }
  0xc0   :  { %543 = vsyncadd [#allocation16], 4294967040 }
  0xc1   :  { %275 = vsyncpa [#allocation3], 1 }
  0xc2   :  { %276 = vsyncpa [#allocation6], 1 }
  0xc3   :  { %277 = vsyncpa [#allocation9], 1 }
  0xc4   :  { %278 = vsyncpa [#allocation4], 1 }
  0xc5   :  { %279 = vsyncpa [#allocation13], 1 }
  0xc6   :  { %280 = vsyncpa [#allocation16], 1 }

</bundles_post_ra>
